<compile_context>
chip_gen: v5e
topology: v5e:2x2
jax: 0.10.0
libtpu: 0.0.40
codegen_flags: <defaults>
</compile_context>

<pallas_src>
import functools

import jax
import jax.numpy as jnp
from jax.experimental import pallas as pl
from jax.experimental.pallas import tpu as pltpu

_LANES = 128


def _sublane_multiple(dtype):
    """Minimum second-minor tile multiple for this dtype (8 f32, 16 bf16, 32 i8)."""
    itemsize = jnp.dtype(dtype).itemsize
    return max(8, 32 // max(itemsize, 1))


def _chip_block_params():
    """(max_block_rows, is_v7x). 2 MiB blocks + forced grid split only on v7x."""
    try:
        kind = jax.devices()[0].device_kind.lower()
    except Exception:
        kind = ""
    is_v7 = ("v7" in kind) or ("7x" in kind)
    return (4096 if is_v7 else 2048), is_v7


def _pick_block_rows(rows, dtype):
    sub = _sublane_multiple(dtype)
    max_rows, is_v7 = _chip_block_params()
    if rows > max_rows:
        return max_rows                      # multiple of sub by construction
    if is_v7 and rows > 512 and rows >= 2 * sub:
        # Single-block regime on a 2-TC chip: split so both TensorCores run.
        return pl.cdiv(pl.cdiv(rows, 2), sub) * sub
    return rows                              # full-dim block (always legal)


def _if_step_ref(dv, v, v_threshold, v_reset):
    """Fused XLA fallback for shapes whose size is not a multiple of 128."""
    h = v + dv
    fired = h >= jnp.asarray(v_threshold, h.dtype)
    spike = fired.astype(h.dtype)
    v_next = jnp.where(fired, jnp.asarray(v_reset, h.dtype), h)
    return spike, v_next


# --------------------------------------------------------------------------
# single step kernel
# --------------------------------------------------------------------------
def _if_hard_reset_kernel(dv_ref, v_ref, spike_ref, v_next_ref, *,
                          v_threshold, v_reset):
    h = v_ref[...] + dv_ref[...]
    fired = h >= jnp.asarray(v_threshold, h.dtype)
    spike_ref[...] = fired.astype(spike_ref.dtype)
    v_next_ref[...] = jnp.where(fired, jnp.asarray(v_reset, h.dtype), h)


@functools.partial(jax.jit, static_argnums=(2, 3), donate_argnums=(1,))
def if_hard_reset_forward(dv, v, v_threshold=1.0, v_reset=0.0):
    """One IF-neuron step. dv, v: same shape/dtype. Returns (spike, v_next)."""
    assert dv.shape == v.shape and dv.dtype == v.dtype
    orig_shape = dv.shape
    dtype = dv.dtype
    n = dv.size
    if n == 0 or n % _LANES != 0:
        # Rare odd-size path: fused elementwise XLA, no padding copies.
        return _if_step_ref(dv, v, v_threshold, v_reset)

    rows = n // _LANES
    dv2 = dv.reshape(rows, _LANES)
    v2 = v.reshape(rows, _LANES)
    block_rows = _pick_block_rows(rows, dtype)
    grid = (pl.cdiv(rows, block_rows),)

    kernel = functools.partial(_if_hard_reset_kernel,
                               v_threshold=float(v_threshold),
                               v_reset=float(v_reset))

    spike2, v_next2 = pl.pallas_call(
        kernel,
        out_shape=(jax.ShapeDtypeStruct((rows, _LANES), dtype),
                   jax.ShapeDtypeStruct((rows, _LANES), dtype)),
        grid=grid,
        in_specs=[pl.BlockSpec((block_rows, _LANES), lambda i: (i, 0)),
                  pl.BlockSpec((block_rows, _LANES), lambda i: (i, 0))],
        out_specs=(pl.BlockSpec((block_rows, _LANES), lambda i: (i, 0)),
                   pl.BlockSpec((block_rows, _LANES), lambda i: (i, 0))),
        # Membrane state updated in place: v (input 1) -> v_next (output 1).
        input_output_aliases={1: 1},
        compiler_params=pltpu.CompilerParams(
            dimension_semantics=("parallel",),
            vmem_limit_bytes=32 * 1024 * 1024),
    )(dv2, v2)

    return spike2.reshape(orig_shape), v_next2.reshape(orig_shape)


# --------------------------------------------------------------------------
# fused multi-step (spike train) kernel: T is the innermost "arbitrary" axis,
# the membrane v lives in a revisited VMEM output block across all T steps.
# --------------------------------------------------------------------------
def _if_multi_step_kernel(dv_ref, v0_ref, spike_ref, v_ref, *,
                          v_threshold, v_reset):
    @pl.when(pl.program_id(1) == 0)
    def _():
        v_ref[...] = v0_ref[...]          # load initial membrane for this tile

    h = v_ref[...] + dv_ref[0]
    fired = h >= jnp.asarray(v_threshold, h.dtype)
    spike_ref[0] = fired.astype(spike_ref.dtype)
    v_ref[...] = jnp.where(fired, jnp.asarray(v_reset, h.dtype), h)
    # v_ref is only written back to HBM when the row-block index changes,
    # i.e. once per tile after the last timestep.


@functools.partial(jax.jit, static_argnums=(2, 3), donate_argnums=(1,))
def if_hard_reset_multi_step(dv_seq, v, v_threshold=1.0, v_reset=0.0):
    """IF-neuron over a whole spike train. dv_seq: [T, ...], v: [...].
    Returns (spikes [T, ...], v_next [...])."""
    T = dv_seq.shape[0]
    step_shape = dv_seq.shape[1:]
    assert v.shape == step_shape and v.dtype == dv_seq.dtype
    dtype = dv_seq.dtype
    n = v.size
    if n == 0 or n % _LANES != 0:
        def body(v_carry, dv_t):
            s, v_next = _if_step_ref(dv_t, v_carry, v_threshold, v_reset)
            return v_next, s
        v_next, spikes = jax.lax.scan(body, v, dv_seq)
        return spikes, v_next

    rows = n // _LANES
    dv3 = dv_seq.reshape(T, rows, _LANES)
    v2 = v.reshape(rows, _LANES)
    block_rows = _pick_block_rows(rows, dtype)
    grid = (pl.cdiv(rows, block_rows), T)   # T innermost -> v stays resident

    kernel = functools.partial(_if_multi_step_kernel,
                               v_threshold=float(v_threshold),
                               v_reset=float(v_reset))

    spikes3, v_next2 = pl.pallas_call(
        kernel,
        out_shape=(jax.ShapeDtypeStruct((T, rows, _LANES), dtype),
                   jax.ShapeDtypeStruct((rows, _LANES), dtype)),
        grid=grid,
        in_specs=[pl.BlockSpec((1, block_rows, _LANES), lambda i, t: (t, i, 0)),
                  pl.BlockSpec((block_rows, _LANES), lambda i, t: (i, 0))],
        out_specs=(pl.BlockSpec((1, block_rows, _LANES), lambda i, t: (t, i, 0)),
                   pl.BlockSpec((block_rows, _LANES), lambda i, t: (i, 0))),
        input_output_aliases={1: 1},
        compiler_params=pltpu.CompilerParams(
            dimension_semantics=("parallel", "arbitrary"),
            vmem_limit_bytes=32 * 1024 * 1024),
    )(dv3, v2)

    return spikes3.reshape((T,) + step_shape), v_next2.reshape(step_shape)


# --------------------------------------------------------------------------
# module wrapper
# --------------------------------------------------------------------------
class IFNode:
    """JAX mirror of wrapper/neuron.py::IFNode (eval/forward path).

    TODO(synk): training path (IFStep with ATan/Sigmoid surrogate gradients)
    is not implemented; only the inference forward is translated.
    """

    def __init__(self, v_threshold=1.0, v_reset=0.0, surrogate_function='ATan',
                 alpha=2.0, detach_reset=False):
        if v_reset is None:
            raise NotImplementedError
        self.v_threshold = float(v_threshold)
        self.v_reset = float(v_reset)
        self.surrogate_function = surrogate_function
        self.alpha = alpha
        self.detach_reset = detach_reset
        self.reset()

    def reset(self):
        self.v = self.v_reset  # scalar until first call

    def _materialize_state(self, shape, dtype):
        if not isinstance(self.v, jnp.ndarray):
            self.v = jnp.full(shape, self.v_reset, dtype=dtype)

    def __call__(self, dv):
        self._materialize_state(dv.shape, dv.dtype)
        spike, self.v = if_hard_reset_forward(dv, self.v,
                                              self.v_threshold, self.v_reset)
        return spike

    def multi_step_forward(self, dv_seq):
        """Fused step over dv_seq[T, ...]; returns spikes[T, ...]."""
        self._materialize_state(dv_seq.shape[1:], dv_seq.dtype)
        spikes, self.v = if_hard_reset_multi_step(dv_seq, self.v,
                                                  self.v_threshold, self.v_reset)
        return spikes


if __name__ == "__main__":
    key = jax.random.PRNGKey(0)

    def ref_step(dv, v, vth, vrst):
        h = v + dv
        fired = h >= vth
        return fired.astype(dv.dtype), jnp.where(fired, vrst, h)

    # --- main case: NCHW, element count multiple of 128 (Pallas path) ------
    B, C, H, W = 2, 4, 16, 16
    dv = jax.random.normal(key, (B, C, H, W), dtype=jnp.float32) * 0.8

    node = IFNode(v_threshold=1.0, v_reset=0.0)
    spike1 = node(dv)            # first step: v starts at v_reset
    spike2 = node(dv)            # second step: membrane carries over
    jax.block_until_ready(spike1)
    jax.block_until_ready(spike2)

    v = jnp.zeros_like(dv)
    s1_ref, v = ref_step(dv, v, 1.0, 0.0)
    s2_ref, v = ref_step(dv, v, 1.0, 0.0)
    assert jnp.array_equal(spike1, s1_ref)
    assert jnp.array_equal(spike2, s2_ref)
    assert jnp.allclose(node.v, v)

    # --- fused multi-step spike train (T timesteps, v resident in VMEM) ----
    T = 4
    keys = jax.random.split(jax.random.PRNGKey(1), T)
    dv_seq = jnp.stack(
        [jax.random.normal(k, (B, C, H, W), dtype=jnp.float32) * 0.8
         for k in keys])
    node_ms = IFNode(v_threshold=1.0, v_reset=0.0)
    spikes_ms = node_ms.multi_step_forward(dv_seq)
    jax.block_until_ready(spikes_ms)

    v = jnp.zeros((B, C, H, W), jnp.float32)
    for t in range(T):
        s_ref, v = ref_step(dv_seq[t], v, 1.0, 0.0)
        assert jnp.array_equal(spikes_ms[t], s_ref)
    assert jnp.allclose(node_ms.v, v)

    # --- odd-sized case (falls back to fused XLA elementwise, no padding) --
    dv_odd = jax.random.normal(jax.random.PRNGKey(2), (3, 5, 7),
                               dtype=jnp.float32) * 0.8
    node_odd = IFNode(v_threshold=1.0, v_reset=0.0)
    s_odd = node_odd(dv_odd)
    jax.block_until_ready(s_odd)
    s_odd_ref, v_odd_ref = ref_step(dv_odd, jnp.zeros_like(dv_odd), 1.0, 0.0)
    assert jnp.array_equal(s_odd, s_odd_ref)
    assert jnp.allclose(node_odd.v, v_odd_ref)

    print("KERNEL_OK")
</pallas_src>

<mosaic_0001>
module attributes {stable_mosaic.version = 11 : i64} {
  func.func @_if_hard_reset_kernel(%arg0: i32, %arg1: memref<16x128xf32, #tpu.memory_space<vmem>>, %arg2: memref<16x128xf32, #tpu.memory_space<vmem>>, %arg3: memref<16x128xf32, #tpu.memory_space<vmem>>, %arg4: memref<16x128xf32, #tpu.memory_space<vmem>>) attributes {dimension_semantics = [#tpu.dimension_semantics<parallel>], iteration_bounds = array<i64: 1>, scalar_prefetch = 0 : i64, scratch_operands = 0 : i64, tpu.core_type = #tpu.core_type<tc>, window_params = [{transform_indices = @transform_0, window_bounds = array<i64: 16, 128>}, {transform_indices = @transform_1, window_bounds = array<i64: 16, 128>}, {transform_indices = @transform_2, window_bounds = array<i64: 16, 128>}, {transform_indices = @transform_3, window_bounds = array<i64: 16, 128>}]} {
    %c0 = arith.constant 0 : index
    %c0_0 = arith.constant 0 : index
    %0 = vector.load %arg2[%c0, %c0_0] : memref<16x128xf32, #tpu.memory_space<vmem>>, vector<16x128xf32>
    %c0_1 = arith.constant 0 : index
    %c0_2 = arith.constant 0 : index
    %1 = vector.load %arg1[%c0_1, %c0_2] : memref<16x128xf32, #tpu.memory_space<vmem>>, vector<16x128xf32>
    %2 = arith.addf %0, %1 : vector<16x128xf32>
    %cst = arith.constant 1.000000e+00 : f32
    %3 = vector.broadcast %cst : f32 to vector<16x128xf32>
    %4 = arith.cmpf oge, %2, %3 : vector<16x128xf32>
    %5 = arith.extui %4 : vector<16x128xi1> to vector<16x128xi32>
    %6 = arith.sitofp %5 : vector<16x128xi32> to vector<16x128xf32>
    %c0_3 = arith.constant 0 : index
    %c0_4 = arith.constant 0 : index
    %7 = vector.load %arg3[%c0_3, %c0_4] : memref<16x128xf32, #tpu.memory_space<vmem>>, vector<16x128xf32>
    tpu.vector_store %arg3[%c0_3, %c0_4], %6 {strides = array<i32>} : memref<16x128xf32, #tpu.memory_space<vmem>>, vector<16x128xf32>,
    %cst_5 = arith.constant 0.000000e+00 : f32
    %8 = vector.broadcast %cst_5 : f32 to vector<16x128xf32>
    %9 = arith.select %4, %8, %2 : vector<16x128xi1>, vector<16x128xf32>
    %c0_6 = arith.constant 0 : index
    %c0_7 = arith.constant 0 : index
    %10 = vector.load %arg4[%c0_6, %c0_7] : memref<16x128xf32, #tpu.memory_space<vmem>>, vector<16x128xf32>
    tpu.vector_store %arg4[%c0_6, %c0_7], %9 {strides = array<i32>} : memref<16x128xf32, #tpu.memory_space<vmem>>, vector<16x128xf32>,
    return
  }
  func.func @transform_0(%arg0: i32) -> (i32, i32) {
    %c0_i32 = arith.constant 0 : i32
    %c0_i32_0 = arith.constant 0 : i32
    return %arg0, %c0_i32 : i32, i32
  }
  func.func @transform_1(%arg0: i32) -> (i32, i32) {
    %c0_i32 = arith.constant 0 : i32
    %c0_i32_0 = arith.constant 0 : i32
    return %arg0, %c0_i32 : i32, i32
  }
  func.func @transform_2(%arg0: i32) -> (i32, i32) {
    %c0_i32 = arith.constant 0 : i32
    %c0_i32_0 = arith.constant 0 : i32
    return %arg0, %c0_i32 : i32, i32
  }
  func.func @transform_3(%arg0: i32) -> (i32, i32) {
    %c0_i32 = arith.constant 0 : i32
    %c0_i32_0 = arith.constant 0 : i32
    return %arg0, %c0_i32 : i32, i32
  }
}

</mosaic_0001>

<bundles_post_ra>
// kernel: if_hard_reset_forward.1
= control target key start
LH: loop header
LB: loop body
LE: loop exit
PB: predicated region body
PF: predicated region fallthrough
CT: control target
= control target key end

     0   :  { %v42_v6 = vmov 0.0   ;;  %s87_s0 = inlined_call_operand.vmem [shape: f32[16,128], index: 0, kind: input, shape index: {}]   ;;  %s88_s1 = inlined_call_operand.vmem [shape: f32[16,128], index: 1, kind: input, shape index: {}, may-alias: {1,3}]   ;;  %s89_s2 = inlined_call_operand.vmem [shape: f32[16,128], index: 2, kind: output, shape index: {0}]   ;;  %s90_s3 = inlined_call_operand.vmem [shape: f32[16,128], index: 3, kind: output, shape index: {1}, may-alias: {1,3}]  }
   0x1   :  { %v13_v0 = vld [vmem:[%s88_s1] sm:$0xff]  ;;  %v14_v2 = vld [vmem:[%s88_s1 + $0x8] sm:$0xff] }
   0x2   :  { %v15_v1 = vld [vmem:[%s87_s0] sm:$0xff]  ;;  %v16_v4 = vld [vmem:[%s87_s0 + $0x8] sm:$0xff] }
   0x3   :  { %v17_v3 = vadd.f32 %v15_v1, %v13_v0  ;;  %v18_v5 = vadd.f32 %v16_v4, %v14_v2 }
   0x5   :  { %vm19_vm0 = vcmp.ge.f32.partialorder %v17_v3, 1.0  ;;  %vm20_vm1 = vcmp.ge.f32.partialorder %v18_v5, 1.0 }
   0x6   :  { %v39_v7 = vsel %vm19_vm0, 1.0, %v42_v6  ;;  %v27_v8 = vsel %vm19_vm0, 0.0, %v17_v3  ;;  %v40_v9 = vsel %vm20_vm1, 1.0, %v42_v6  ;;  %v28_v10 = vsel %vm20_vm1, 0.0, %v18_v5 }
   0x7   :  { %25 = vst [vmem:[%s89_s2] sm:$0xff] %v39_v7 }
   0x8   :  { %26 = vst [vmem:[%s89_s2 + $0x8] sm:$0xff] %v40_v9 }
   0x9   :  { %29 = vst [vmem:[%s90_s3] sm:$0xff] %v27_v8 }
   0xa   :  { %30 = vst [vmem:[%s90_s3 + $0x8] sm:$0xff] %v28_v10 }

</bundles_post_ra>
